<compile_context>
chip_gen: v7x
topology: tpu7x:2x2x1
jax: 0.10.0
libtpu: 0.0.40
codegen_flags: <defaults>
</compile_context>

<pallas_src>
import functools

import jax
import jax.numpy as jnp
from jax.experimental import pallas as pl
from jax.experimental.pallas import tpu as pltpu


def _norm_kernel(x_ref, alpha_ref, bias_ref, o_ref, *, d, eps, approx_recip):
    # x_ref / o_ref block: (d, TL)  (leading batch dim squeezed away)
    # alpha_ref / bias_ref block: (d, 1)
    x = x_ref[...].astype(jnp.float32)            # (d, TL)
    alpha = alpha_ref[...].astype(jnp.float32)    # (d, 1)
    bias = bias_ref[...].astype(jnp.float32)      # (d, 1)

    if d > 1:
        avg = jnp.mean(x, axis=0, keepdims=True)                      # (1, TL)
        centered = x - avg
        # unbiased variance (ddof=1), matching torch.Tensor.std default
        var = jnp.sum(centered * centered, axis=0, keepdims=True) / (d - 1)
        # eps after sqrt (== torch's std + eps); reciprocal on the (1, TL) row
        # runs on the EUP slot instead of a full-tile f32 divide.
        inv_std = pl.reciprocal(jnp.sqrt(var) + eps, approx=approx_recip)
        out = (centered * inv_std) * alpha + bias
    else:
        # torch path: avg = 0, std = 1  (intentionally no centering / scaling)
        out = alpha * x + bias

    o_ref[...] = out.astype(o_ref.dtype)


def _pick_tile_l(d, L, itemsize, *, block_budget_bytes=8 << 20, max_tl=2048):
    """Pick a trailing-axis tile size: multiple of 128, dividing L, sized so
    double-buffered in+out blocks (4 * d * TL * itemsize) stay within budget."""
    if L <= 128:
        return L
    budget_tl = max(1, block_budget_bytes // (4 * d * itemsize))
    tl = min(max_tl, budget_tl, L)
    tl = max(128, (tl // 128) * 128)
    if L % tl == 0:
        return tl
    # prefer a 128-aligned tile that divides L; otherwise fall back to full L
    for cand in range(tl, 127, -128):
        if L % cand == 0:
            return cand
    return L


def norm_forward(x, alpha, bias, *, eps=1e-6, tile_l=None, approx_recip=False):
    """Pallas TPU implementation of Norm(d, axis=-2).forward for x of shape (B, d, L)."""
    B, d, L = x.shape
    itemsize = jnp.dtype(x.dtype).itemsize
    tl = tile_l if tile_l is not None else _pick_tile_l(d, L, itemsize)
    num_l_blocks = pl.cdiv(L, tl)

    kernel = functools.partial(_norm_kernel, d=d, eps=eps, approx_recip=approx_recip)

    # Advisory cost: read + write x once, plus small params; one sqrt+recip per lane-row.
    cost = pl.CostEstimate(
        flops=6 * B * d * L,
        transcendentals=2 * B * L,
        bytes_accessed=2 * B * d * L * itemsize + 2 * d * jnp.dtype(alpha.dtype).itemsize,
    )

    return pl.pallas_call(
        kernel,
        out_shape=jax.ShapeDtypeStruct((B, d, L), x.dtype),
        grid_spec=pltpu.PrefetchScalarGridSpec(
            num_scalar_prefetch=0,
            grid=(B, num_l_blocks),
            in_specs=[
                pl.BlockSpec((pl.Squeezed(), d, tl), lambda b, l: (b, 0, l)),
                pl.BlockSpec((d, 1), lambda b, l: (0, 0)),   # VMEM-resident across steps
                pl.BlockSpec((d, 1), lambda b, l: (0, 0)),
            ],
            out_specs=pl.BlockSpec((pl.Squeezed(), d, tl), lambda b, l: (b, 0, l)),
        ),
        compiler_params=pltpu.CompilerParams(
            dimension_semantics=("parallel", "parallel"),
            vmem_limit_bytes=32 * 1024 * 1024,
        ),
        cost_estimate=cost,
    )(x, alpha, bias)


def norm_reference(x, alpha, bias, *, eps=1e-6):
    """Pure-JAX reference mirroring the PyTorch forward (axis=-2, unbiased std)."""
    d = x.shape[-2]
    if d > 1:
        avg = jnp.mean(x, axis=-2, keepdims=True)
        std = jnp.std(x, axis=-2, keepdims=True, ddof=1) + eps
    else:
        avg = 0.0
        std = 1.0
    return alpha * (x - avg) / std + bias


if __name__ == "__main__":
    key = jax.random.PRNGKey(0)
    k_x, k_a, k_b = jax.random.split(key, 3)

    # Small shapes consistent with the module: batch=2, d=32 features, length=1024
    # (large enough that the L-tiling path with grid=(B, L//TL) is exercised).
    B, d, L = 2, 32, 1024
    x = jax.random.normal(k_x, (B, d, L), dtype=jnp.float32)
    # deterministic "randn" init for alpha/bias of shape (d, 1), as in __init__ (axis=-2)
    alpha = jax.random.normal(k_a, (d, 1), dtype=jnp.float32)
    bias = jax.random.normal(k_b, (d, 1), dtype=jnp.float32)

    out = norm_forward(x, alpha, bias, tile_l=512)
    out = jax.block_until_ready(out)

    ref = norm_reference(x, alpha, bias)
    assert out.shape == x.shape and out.dtype == x.dtype
    assert jnp.allclose(out, ref, atol=1e-4, rtol=1e-4), "mismatch vs reference"

    print("KERNEL_OK")
</pallas_src>

<mosaic_0001>
module attributes {stable_mosaic.version = 11 : i64} {
  func.func @_norm_kernel(%arg0: i32, %arg1: i32, %arg2: memref<1x32x512xf32, #tpu.memory_space<vmem>>, %arg3: memref<32x1xf32, #tpu.memory_space<vmem>>, %arg4: memref<32x1xf32, #tpu.memory_space<vmem>>, %arg5: memref<1x32x512xf32, #tpu.memory_space<vmem>>) attributes {dimension_semantics = [#tpu.dimension_semantics<parallel>, #tpu.dimension_semantics<parallel>], iteration_bounds = array<i64: 2, 2>, scalar_prefetch = 0 : i64, scratch_operands = 0 : i64, tpu.core_type = #tpu.core_type<tc>, window_params = [{transform_indices = @transform_0, window_bounds = array<i64: 1, 32, 512>}, {pipeline_mode = #tpu.pipeline_mode<synchronous>, transform_indices = @transform_1, window_bounds = array<i64: 32, 1>}, {pipeline_mode = #tpu.pipeline_mode<synchronous>, transform_indices = @transform_2, window_bounds = array<i64: 32, 1>}, {transform_indices = @transform_3, window_bounds = array<i64: 1, 32, 512>}]} {
    %c0 = arith.constant 0 : index
    %c0_0 = arith.constant 0 : index
    %c0_1 = arith.constant 0 : index
    %0 = vector.load %arg2[%c0, %c0_0, %c0_1] : memref<1x32x512xf32, #tpu.memory_space<vmem>>, vector<1x32x512xf32>
    %1 = vector.shape_cast %0 : vector<1x32x512xf32> to vector<32x512xf32>
    %c0_2 = arith.constant 0 : index
    %c0_3 = arith.constant 0 : index
    %2 = vector.load %arg3[%c0_2, %c0_3] : memref<32x1xf32, #tpu.memory_space<vmem>>, vector<32x1xf32>
    %c0_4 = arith.constant 0 : index
    %c0_5 = arith.constant 0 : index
    %3 = vector.load %arg4[%c0_4, %c0_5] : memref<32x1xf32, #tpu.memory_space<vmem>>, vector<32x1xf32>
    %cst = arith.constant dense<0.000000e+00> : vector<512xf32>
    %4 = vector.multi_reduction <add>, %1, %cst [0] : vector<32x512xf32> to vector<512xf32>
    %5 = vector.shape_cast %4 : vector<512xf32> to vector<1x512xf32>
    %cst_6 = arith.constant 3.200000e+01 : f32
    %6 = vector.broadcast %cst_6 : f32 to vector<1x512xf32>
    %7 = arith.divf %5, %6 : vector<1x512xf32>
    %8 = vector.broadcast %7 : vector<1x512xf32> to vector<32x512xf32>
    %9 = arith.subf %1, %8 : vector<32x512xf32>
    %10 = arith.mulf %9, %9 : vector<32x512xf32>
    %cst_7 = arith.constant dense<0.000000e+00> : vector<512xf32>
    %11 = vector.multi_reduction <add>, %10, %cst_7 [0] : vector<32x512xf32> to vector<512xf32>
    %12 = vector.shape_cast %11 : vector<512xf32> to vector<1x512xf32>
    %cst_8 = arith.constant 3.100000e+01 : f32
    %13 = vector.broadcast %cst_8 : f32 to vector<1x512xf32>
    %14 = arith.divf %12, %13 : vector<1x512xf32>
    %15 = math.sqrt %14 : vector<1x512xf32>
    %cst_9 = arith.constant 9.99999997E-7 : f32
    %16 = vector.broadcast %cst_9 : f32 to vector<1x512xf32>
    %17 = arith.addf %15, %16 : vector<1x512xf32>
    %18 = tpu.reciprocal %17 : vector<1x512xf32> -> vector<1x512xf32>
    %19 = vector.broadcast %18 : vector<1x512xf32> to vector<32x512xf32>
    %20 = arith.mulf %9, %19 : vector<32x512xf32>
    %21 = vector.broadcast %2 : vector<32x1xf32> to vector<32x512xf32>
    %22 = arith.mulf %20, %21 : vector<32x512xf32>
    %23 = vector.broadcast %3 : vector<32x1xf32> to vector<32x512xf32>
    %24 = arith.addf %22, %23 : vector<32x512xf32>
    %c0_10 = arith.constant 0 : index
    %c0_11 = arith.constant 0 : index
    %c0_12 = arith.constant 0 : index
    %25 = vector.load %arg5[%c0_10, %c0_11, %c0_12] : memref<1x32x512xf32, #tpu.memory_space<vmem>>, vector<1x32x512xf32>
    %26 = vector.shape_cast %25 : vector<1x32x512xf32> to vector<32x512xf32>
    %27 = vector.shape_cast %24 : vector<32x512xf32> to vector<1x32x512xf32>
    tpu.vector_store %arg5[%c0_10, %c0_11, %c0_12], %27 {strides = array<i32>} : memref<1x32x512xf32, #tpu.memory_space<vmem>>, vector<1x32x512xf32>,
    return
  }
  func.func @transform_0(%arg0: i32, %arg1: i32) -> (i32, i32, i32) {
    %c0_i32 = arith.constant 0 : i32
    %c0_i32_0 = arith.constant 0 : i32
    return %arg0, %c0_i32, %arg1 : i32, i32, i32
  }
  func.func @transform_1(%arg0: i32, %arg1: i32) -> (i32, i32) {
    %c0_i32 = arith.constant 0 : i32
    %c0_i32_0 = arith.constant 0 : i32
    %c0_i32_1 = arith.constant 0 : i32
    return %c0_i32, %c0_i32_0 : i32, i32
  }
  func.func @transform_2(%arg0: i32, %arg1: i32) -> (i32, i32) {
    %c0_i32 = arith.constant 0 : i32
    %c0_i32_0 = arith.constant 0 : i32
    %c0_i32_1 = arith.constant 0 : i32
    return %c0_i32, %c0_i32_0 : i32, i32
  }
  func.func @transform_3(%arg0: i32, %arg1: i32) -> (i32, i32, i32) {
    %c0_i32 = arith.constant 0 : i32
    %c0_i32_0 = arith.constant 0 : i32
    return %arg0, %c0_i32, %arg1 : i32, i32, i32
  }
}

</mosaic_0001>

<bundles_post_ra>
// kernel: tpu_custom_call.1
= control target key start
LH: loop header
LB: loop body
LE: loop exit
PB: predicated region body
PF: predicated region fallthrough
CT: control target
= control target key end

     0   :  { %8 = vsyncpa [#allocation3], 0  ;;  %s1265_s0 = inlined_call_operand.hbm [shape: f32[2,32,1024], index: 0, kind: input, shape index: {}]   ;;  %s1266_s1 = inlined_call_operand.vmem [shape: f32[32,1], index: 1, kind: input, shape index: {}]   ;;  %s1267_s2 = inlined_call_operand.vmem [shape: f32[32,1], index: 2, kind: input, shape index: {}]   ;;  %s1268_s3 = inlined_call_operand.hbm [shape: f32[2,32,1024], index: 3, kind: output, shape index: {}]  }
   0x1   :  { %10 = vsyncpa [#allocation3 + $0x1], 0 }
   0x2   :  { %11 = vsyncpa [#allocation4], 0 }
   0x3   :  { %13 = vsyncpa [#allocation4 + $0x1], 0  ;;  %s872_s12 = smov 0   ;;  %s874_s13 = smov 0  }
   0x4   :  { %s876_s14 = smov 0   ;;  %s878_s15 = smov 0  }
   0x5   :  { %s880_s16 = smov 0   ;;  %s882_s17 = smov 0  }
   0x6   :  { %s884_s18 = smov 0   ;;  %s886_s19 = smov 0  }
   0x7 LB: > { %s593_s20 = sadd.s32 4294967295, %s841_s19   ;;  %s594_s21 = sadd.s32 4294967294, %s841_s19   ;;  %s841_s19 = sphi %s886_s19, %s19_s19   ;;  %s837_s18 = sphi %s884_s18, %s1284_s18   ;;  %s833_s17 = sphi %s882_s17, %s1283_s17   ;;  %s829_s16 = sphi %s880_s16, %s1282_s16   ;;  %s825_s15 = sphi %s878_s15, %s1281_s15   ;;  %s821_s14 = sphi %s876_s14, %s1280_s14   ;;  %s817_s13 = sphi %s874_s13, %s1279_s13   ;;  %s813_s12 = sphi %s872_s12, %s1278_s12  }
   0x8   : > { %s28_s22 = sadd.s32 1, %s833_s17  ;;  %s31_s23 = sadd.s32 1, %s837_s18 }
   0x9   : > { %p29_p0 = scmp.ge.s32.totalorder %s28_s22, 2  ;;  %s40_s24 = sadd.s32 1, %s821_s14 }
   0xa   : > { %p47_p1 = scmp.ne.s32.totalorder %s821_s14, %s817_s13  ;;  %p48_p2 = scmp.eq.s32.totalorder %s841_s19, 0 }
   0xb   : > { %s1286_s22 = smov (%p29_p0, %s28_s22), 0  ;;  %s1288_s23 = smov (!%p29_p0, %s31_s23), %s837_s18 }
   0xc   : > { %s36_s25 = ssub.s32 %s833_s17, %s1286_s22  ;;  %p925_p3 = por %p48_p2, %p47_p1 }
   0xd   : > { %p33_p4 = scmp.ge.s32.totalorder %s1288_s23, 2  ;;  %p53_p5 = scmp.ne.s32.totalorder %s817_s13, %s813_s12 }
   0xe   : > { %p54_p6 = scmp.eq.s32.totalorder %s593_s20, 0  ;;  %p121_p7 = scmp.eq.s32.totalorder %s593_s20, 3 }
   0xf   : > { %s1290_s23 = smov (%p33_p4, %s1288_s23), 0  ;;  %p127_p10 = scmp.eq.s32.totalorder %s594_s21, 3 }
  0x10   : > { %p933_p8 = por %p54_p6, %p53_p5  ;;  %p937_p9 = por %p121_p7, %p47_p1 }
  0x11   : > { %s35_s29 = ssub.s32 %s837_s18, %s1290_s23  ;;  %p943_p12 = por %p127_p10, %p53_p5 }
  0x12   : > { %s1272_s28 = scalar_select %p937_p9, 1, 0 }
  0x13   : > { %s37_s30 = sor.u32 %s36_s25, %s35_s29  ;;  %p622_p13 = scmp.lt.s32.totalorder %s841_s19, 4 }
  0x14   : > { %p38_p11 = scmp.eq.s32.totalorder %s37_s30, 0  ;;  %s153_s5 = sand.u32 1, %s821_s14  }
  0x15   : > { %s1273_s4 = scalar_select %p943_p12, 1, 0 }
  0x16   : > { %s950_s6 = scalar_select %p38_p11, %s821_s14, %s40_s24  }
  0x17   : > { %s597_s7 = sshll.u32 %s153_s5, 7  ;;  %s598_s8 = sshll.u32 %s833_s17, 2 }
  0x18   : > { %s599_s9 = sshll.u32 %s837_s18, 5  ;;  %s157_s10 = scalar_lea.vmem [#allocation2], %s597_s7 }
  0x19   : > { %s166_s11 = sshll.u32 %s157_s10, 4  ;;  %s163_s20 = sadd.s32 %s599_s9, %s598_s8  ;;  %s954_s11 = int_to_ptr.vmem [resolvable:$true] %s166_s11 }
  0x1a   : > { %s600_s21 = sshll.u32 %s163_s20, 7  ;;  %p958_p0 = pnand %p622_p13, %p925_p3 }
  0x1b   : > { %s965_s24 = scalar_lea.hbm %s1265_s0, %s600_s21  ;;  %s968_s7 = scalar_lea.sflag [#allocation3], %s153_s5 }
  0x1c   : > { %s713_s8 = scalar_lea.hbm %s965_s24, 2048  ;;  %p715_p3 = pneg %p958_p0 }
  0x1d   : > { %p714_p2 = scmp.ne.s32.totalorder %s965_s24, %s713_s8  ;;  %s718_s10 = scalar_lea.hbm %s1265_s0, 8192 }
  0x1e   : > { %p719_p6 = scmp.lt.u32.totalorder %s965_s24, %s1265_s0  ;;  %p720_p7 = scmp.lt.u32.totalorder %s718_s10, %s713_s8 }
  0x1f   : > { %p716_p4 = pnand %p715_p3, %p714_p2  ;;  %p722_p11 = scmp.lt.u32.totalorder %s713_s8, %s965_s24 }
  0x20   : > { %p721_p10 = por %p720_p7, %p719_p6 }
  0x21   : > { %p717_p5 = pneg %p716_p4 }
  0x22   : > { %p723_p13 = por %p722_p11, %p721_p10 }
  0x24   : > { %p724_p1 = pnand %p723_p13, %p717_p5 }
  0x26   : > { %727 = shalt.err (!%p724_p1)
}
  0x27   : > { %s728_s5 = scalar_lea.vmem %s954_s11, 2048  ;;  %s843_s29 = smov [#allocation2]  }
  0x28   : > { %p729_p2 = scmp.ne.s32.totalorder %s954_s11, %s728_s5  ;;  %s733_s30 = sshll.u32 %s843_s29, 4  ;;  %s734_s30 = int_to_ptr.vmem [resolvable:$false] %s733_s30 }
  0x29   : > { %s735_s26 = scalar_lea.vmem %s734_s30, 4096  ;;  %p736_p9 = scmp.lt.s32.totalorder %s954_s11, %s734_s30 }
  0x2a   : > { %p731_p4 = pnand %p729_p2, %p715_p3  ;;  %p737_p6 = scmp.lt.s32.totalorder %s735_s26, %s728_s5 }
  0x2c   : > { %p732_p12 = pneg %p731_p4  ;;  %p738_p7 = por %p737_p6, %p736_p9 }
  0x2e   : > { %p739_p10 = pnand %p738_p7, %p732_p12 }
  0x30   : > { %742 = shalt.err (!%p739_p10)
}
  0x31   : > { %s844_s8 = smov 1024   ;;  %s845_s9 = smov 512  }
  0x32   : > { %s846_s10 = smov 32   ;;  %p174_p1 = scmp.lt.s32.totalorder %s841_s19, 5 }
  0x33   : > { %617 = dma.hbm_to_vmem [thread:$0]  (!%p958_p0), %s965_s24, 2048, %s954_s11, %s968_s7, %s844_s8, %s845_s9, %s846_s10  }
  0x34   : > { %p1275_p3 = scmp.ge.s32.totalorder %s841_s19, 1 }
  0x36   : > { %p175_p5 = pnand %p1275_p3, %p174_p1 }
  0x37   : > { %s1000_s20 = sand.u32 (!%p175_p5), 1, %s817_s13  }
  0x38   : > { %178 = sbr.rel (%p175_p5) target bundleno = 227 (0xe3), region = 32  ;;  %s602_s21 = sshll.u32 (!%p175_p5), %s1000_s20, 7 }
  0x39   : > { %s181_s5 = scalar_lea.sflag (!%p175_p5), [#allocation3], %s1000_s20  ;;  %s1006_s29 = scalar_lea.vmem (!%p175_p5), [#allocation2], %s602_s21 }
  0x3f   : > { %804 = dma.done.wait (%p933_p8), %s181_s5, 2048  }
  0x40   : > { %806 = vsyncadd (%p933_p8), %s181_s5, 4294965248  ;;  %v847_v0 = vmov 0   ;;  %v227_v1 = vld [vmem:[%s1266_s1 + $0x10] sm:$0xff]  ;;  %v225_v2 = vld [vmem:[%s1266_s1] sm:$0xff]  ;;  %s606_s30 = sshll.u32 %s829_s16, 5  ;;  %s1187_s26 = scalar_lea.vmem [#allocation5], %s602_s21 }
  0x41   : > { %696 = vset.pattern.permute.xlu1 %v847_v0  ;;  %695 = vset.pattern.permute.xlu0 %v847_v0  ;;  %v228_v3 = vld [vmem:[%s1266_s1 + $0x18] sm:$0xff]  ;;  %v226_v4 = vld [vmem:[%s1266_s1 + $0x8] sm:$0xff]  ;;  %v1025_v5 = vld [vmem:[%s1006_s29] sm:$0xff]  ;;  %s503_s8 = sshll.u32 %s1187_s26, 4  ;;  %s488_s5 = scalar_lea.sflag [#allocation4], %s1000_s20  ;;  %s1203_s8 = int_to_ptr.vmem [resolvable:$true] %s503_s8 }
  0x42   : > { %411 = vperm.xlu1 %696, %v227_v1   ;;  %401 = vperm.xlu0 %695, %v225_v2   ;;  %v1028_v6 = vld [vmem:[%s1006_s29 + $0x8] sm:$0xff]  ;;  %v1031_v7 = vld [vmem:[%s1006_s29 + $0x10] sm:$0xff]  ;;  %v1034_v8 = vld [vmem:[%s1006_s29 + $0x18] sm:$0xff]  ;;  %s743_s11 = scalar_lea.vmem %s1203_s8, 2048  ;;  %p1276_p9 = scmp.ne.s32.totalorder %s1272_s28, 0 }
  0x43   : > { %v230_v9 = vld [vmem:[%s1267_s2 + $0x8] sm:$0xff]  ;;  %v229_v10 = vld [vmem:[%s1267_s2] sm:$0xff]  ;;  %v1045_v13 = vld [vmem:[%s1006_s29 + $0x30] sm:$0xff]  ;;  %p744_p8 = scmp.ne.s32.totalorder %s1203_s8, %s743_s11  ;;  %s848_s25 = smov [#allocation5]  }
  0x44   : > { %v213_v11 = vld [vmem:[%s1006_s29 + $0x20] sm:$0xff]  ;;  %v214_v12 = vld [vmem:[%s1006_s29 + $0x28] sm:$0xff]  ;;  %v216_v14 = vld [vmem:[%s1006_s29 + $0x38] sm:$0xff]  ;;  %v251_v19 = vadd.f32 %v1045_v13, %v1031_v7  ;;  %s747_s24 = sshll.u32 %s848_s25, 4  ;;  %s748_s24 = int_to_ptr.vmem [resolvable:$false] %s747_s24 }
  0x45   : > { %v217_v15 = vld [vmem:[%s1006_s29 + $0x40] sm:$0xff]  ;;  %v1050_v16 = vld [vmem:[%s1006_s29 + $0x48] sm:$0xff]  ;;  %v233_v17 = vadd.f32 %v213_v11, %v1025_v5  ;;  %v242_v18 = vadd.f32 %v214_v12, %v1028_v6  ;;  %v1057_v20 = vld [vmem:[%s1006_s29 + $0x50] sm:$0xff]  ;;  %v260_v23 = vadd.f32 %v216_v14, %v1034_v8  ;;  %p745_p12 = pnand %p744_p8, %p1276_p9  ;;  %s749_s7 = scalar_lea.vmem %s748_s24, 4096 }
  0x46   : > { %416 = vperm.xlu1 %696, %v228_v3   ;;  %406 = vperm.xlu0 %695, %v226_v4   ;;  %v1060_v21 = vld [vmem:[%s1006_s29 + $0x58] sm:$0xff]  ;;  %v1063_v22 = vld [vmem:[%s1006_s29 + $0x60] sm:$0xff]  ;;  %v1067_v24 = vld [vmem:[%s1006_s29 + $0x68] sm:$0xff]  ;;  %v252_v27 = vadd.f32 %v251_v19, %v1057_v20  ;;  %p750_p11 = scmp.lt.s32.totalorder %s1203_s8, %s748_s24  ;;  %p751_p13 = scmp.lt.s32.totalorder %s749_s7, %s743_s11 }
  0x47   : > { %v234_v25 = vadd.f32 %v233_v17, %v217_v15  ;;  %v243_v26 = vadd.f32 %v242_v18, %v1050_v16  ;;  %v1072_v28 = vld [vmem:[%s1006_s29 + $0x70] sm:$0xff]  ;;  %v261_v29 = vadd.f32 %v260_v23, %v1060_v21  ;;  %v1076_v30 = vld [vmem:[%s1006_s29 + $0x78] sm:$0xff]  ;;  %s605_s29 = sshll.u32 %s825_s15, 2  ;;  %p746_p0 = pneg %p745_p12 }
  0x48   : > { %v232_v32 = vld [vmem:[%s1267_s2 + $0x18] sm:$0xff]  ;;  %v231_v33 = vld [vmem:[%s1267_s2 + $0x10] sm:$0xff]  ;;  %v253_v35 = vadd.f32 %v252_v27, %v1072_v28  ;;  %s1182_s15 = sadd.s32 %s606_s30, %s605_s29  ;;  %p752_p2 = por %p751_p13, %p750_p11 }
  0x49   : > { %v235_v31 = vadd.f32 %v234_v25, %v1063_v22  ;;  %v244_v34 = vadd.f32 %v243_v26, %v1067_v24  ;;  %v262_v36 = vadd.f32 %v261_v29, %v1076_v30  ;;  %s607_s16 = sshll.u32 %s1182_s15, 7 }
  0x4a   : > { %442 = vperm.xlu1 %696, %v230_v9   ;;  %437 = vperm.xlu0 %695, %v229_v10   ;;  %v254_v39 = vrot.slane %v253_v35, 4  ;;  %s1201_s10 = scalar_lea.hbm %s1268_s3, %s607_s16  ;;  %p753_p4 = pnand %p752_p2, %p746_p0 }
  0x4b   : > { %v236_v37 = vrot.slane %v235_v31, 4  ;;  %v245_v38 = vrot.slane %v244_v34, 4  ;;  %v263_v40 = vrot.slane %v262_v36, 4 }
  0x4c   : > { %v255_v43 = vadd.f32 %v254_v39, %v253_v35 }
  0x4d   : > { %v237_v41 = vadd.f32 %v236_v37, %v235_v31  ;;  %v246_v42 = vadd.f32 %v245_v38, %v244_v34  ;;  %v264_v44 = vadd.f32 %v263_v40, %v262_v36 }
  0x4e   : > { %452 = vperm.xlu1 %696, %v232_v32   ;;  %447 = vperm.xlu0 %695, %v231_v33   ;;  %v256_v47 = vrot.slane %v255_v43, 2 }
  0x4f   : > { %v238_v45 = vrot.slane %v237_v41, 2  ;;  %v247_v46 = vrot.slane %v246_v42, 2  ;;  %v265_v48 = vrot.slane %v264_v44, 2 }
  0x50   : > { %v257_v51 = vadd.f32 %v256_v47, %v255_v43 }
  0x51   : > { %v239_v49 = vadd.f32 %v238_v45, %v237_v41  ;;  %v248_v50 = vadd.f32 %v247_v46, %v246_v42  ;;  %v266_v52 = vadd.f32 %v265_v48, %v264_v44 }
  0x52   : > { %v258_v55 = vrot.slane %v257_v51, 1 }
  0x53   : > { %v240_v53 = vrot.slane %v239_v49, 1  ;;  %v249_v54 = vrot.slane %v248_v50, 1  ;;  %v267_v56 = vrot.slane %v266_v52, 1 }
  0x54   : > { %v259_v59 = vadd.f32 %v258_v55, %v257_v51 }
  0x55   : > { %v241_v57 = vadd.f32 %v240_v53, %v239_v49  ;;  %v250_v58 = vadd.f32 %v249_v54, %v248_v50  ;;  %v268_v60 = vadd.f32 %v267_v56, %v266_v52 }
  0x56   : > { %v272_v63 = vmul.f32 0.03125, %v259_v59 }
  0x57   : > { %v270_v61 = vmul.f32 0.03125, %v241_v57  ;;  %v271_v62 = vmul.f32 0.03125, %v250_v58  ;;  %v273_v0 = vmul.f32 0.03125, %v268_v60 }
  0x58   : > { %v1099_v9 = vsub.f32 %v1031_v7, %v272_v63  ;;  %v1102_v10 = vsub.f32 %v1045_v13, %v272_v63  ;;  %v1123_v13 = vsub.f32 %v1057_v20, %v272_v63  ;;  %v1147_v31 = vsub.f32 %v1072_v28, %v272_v63 }
  0x59   : > { %v1089_v1 = vsub.f32 %v1025_v5, %v270_v61  ;;  %v1091_v2 = vsub.f32 %v213_v11, %v270_v61  ;;  %v1094_v3 = vsub.f32 %v1028_v6, %v271_v62  ;;  %v1096_v4 = vsub.f32 %v214_v12, %v271_v62 }
  0x5a   : > { %v1105_v17 = vsub.f32 %v1034_v8, %v273_v0  ;;  %v1107_v18 = vsub.f32 %v216_v14, %v273_v0  ;;  %v1109_v5 = vsub.f32 %v217_v15, %v270_v61  ;;  %v1116_v12 = vsub.f32 %v1050_v16, %v271_v62 }
  0x5b   : > { %v290_v11 = vmul.f32 %v1089_v1, %v1089_v1  ;;  %v294_v6 = vmul.f32 %v1091_v2, %v1091_v2  ;;  %v291_v7 = vmul.f32 %v1094_v3, %v1094_v3  ;;  %v295_v8 = vmul.f32 %v1096_v4, %v1096_v4 }
  0x5c   : > { %v292_v14 = vmul.f32 %v1099_v9, %v1099_v9  ;;  %v296_v15 = vmul.f32 %v1102_v10, %v1102_v10  ;;  %v1130_v19 = vsub.f32 %v1060_v21, %v273_v0  ;;  %v293_v16 = vmul.f32 %v1105_v17, %v1105_v17 }
  0x5d   : > { %v297_v23 = vmul.f32 %v1107_v18, %v1107_v18  ;;  %v1137_v25 = vsub.f32 %v1063_v22, %v270_v61  ;;  %v298_v20 = vmul.f32 %v1109_v5, %v1109_v5  ;;  %v306_v26 = vadd.f32 %v294_v6, %v290_v11 }
  0x5e   : > { %v1142_v27 = vsub.f32 %v1067_v24, %v271_v62  ;;  %v299_v21 = vmul.f32 %v1116_v12, %v1116_v12  ;;  %v315_v29 = vadd.f32 %v295_v8, %v291_v7  ;;  %v300_v32 = vmul.f32 %v1123_v13, %v1123_v13 }
  0x5f   : > { %v324_v33 = vadd.f32 %v296_v15, %v292_v14  ;;  %v1152_v22 = vsub.f32 %v1076_v30, %v273_v0  ;;  %v301_v34 = vmul.f32 %v1130_v19, %v1130_v19  ;;  %v333_v35 = vadd.f32 %v297_v23, %v293_v16 }
  0x60   : > { %v302_v24 = vmul.f32 %v1137_v25, %v1137_v25  ;;  %v307_v36 = vadd.f32 %v306_v26, %v298_v20  ;;  %v303_v37 = vmul.f32 %v1142_v27, %v1142_v27  ;;  %v316_v28 = vadd.f32 %v315_v29, %v299_v21 }
  0x61   : > { %v304_v38 = vmul.f32 %v1147_v31, %v1147_v31  ;;  %v325_v39 = vadd.f32 %v324_v33, %v300_v32  ;;  %v305_v30 = vmul.f32 %v1152_v22, %v1152_v22  ;;  %v334_v40 = vadd.f32 %v333_v35, %v301_v34 }
  0x62   : > { %v308_v41 = vadd.f32 %v307_v36, %v302_v24  ;;  %v317_v42 = vadd.f32 %v316_v28, %v303_v37 }
  0x63   : > { %v326_v43 = vadd.f32 %v325_v39, %v304_v38  ;;  %v335_v44 = vadd.f32 %v334_v40, %v305_v30 }
  0x64   : > { %v309_v45 = vrot.slane %v308_v41, 4  ;;  %v318_v46 = vrot.slane %v317_v42, 4 }
  0x65   : > { %v327_v47 = vrot.slane %v326_v43, 4  ;;  %v336_v48 = vrot.slane %v335_v44, 4 }
  0x66   : > { %v310_v49 = vadd.f32 %v309_v45, %v308_v41  ;;  %v319_v50 = vadd.f32 %v318_v46, %v317_v42 }
  0x67   : > { %v328_v51 = vadd.f32 %v327_v47, %v326_v43  ;;  %v337_v52 = vadd.f32 %v336_v48, %v335_v44 }
  0x68   : > { %v311_v53 = vrot.slane %v310_v49, 2  ;;  %v320_v54 = vrot.slane %v319_v50, 2 }
  0x69   : > { %v329_v55 = vrot.slane %v328_v51, 2  ;;  %v338_v56 = vrot.slane %v337_v52, 2 }
  0x6a   : > { %v312_v57 = vadd.f32 %v311_v53, %v310_v49  ;;  %v321_v58 = vadd.f32 %v320_v54, %v319_v50 }
  0x6b   : > { %v330_v59 = vadd.f32 %v329_v55, %v328_v51  ;;  %v339_v60 = vadd.f32 %v338_v56, %v337_v52 }
  0x6c   : > { %v313_v61 = vrot.slane %v312_v57, 1  ;;  %v322_v62 = vrot.slane %v321_v58, 1 }
  0x6d   : > { %v331_v63 = vrot.slane %v330_v59, 1  ;;  %v340_v0 = vrot.slane %v339_v60, 1 }
  0x6e   : > { %v314_v11 = vadd.f32 %v313_v61, %v312_v57  ;;  %v323_v6 = vadd.f32 %v322_v62, %v321_v58 }
  0x6f   : > { %v332_v7 = vadd.f32 %v331_v63, %v330_v59  ;;  %v341_v8 = vadd.f32 %v340_v0, %v339_v60 }
  0x70   : > { %v343_v14 = vmul.f32 0.032258064, %v314_v11  ;;  %v344_v15 = vmul.f32 0.032258064, %v323_v6 }
  0x71   : > { %v345_v16 = vmul.f32 0.032258064, %v332_v7  ;;  %v346_v23 = vmul.f32 0.032258064, %v341_v8 }
  0x72   : > { %697 = vrsqrt.f32 %v343_v14  ;;  %vm349_vm0 = vcmp.eq.f32.partialorder %v343_v14, inf  ;;  %vm356_vm1 = vcmp.eq.f32.partialorder %v344_v15, inf  ;;  %v352_v35 = vand.u32 2147483648, %v343_v14 }
  0x73   : > { %699 = vrsqrt.f32 %v344_v15  ;;  %vm363_vm2 = vcmp.eq.f32.partialorder %v345_v16, inf  ;;  %vm351_vm3 = vcmp.eq.f32.partialorder %v343_v14, 0.0  ;;  %v359_v37 = vand.u32 2147483648, %v344_v15 }
  0x74   : > { %701 = vrsqrt.f32 %v345_v16  ;;  %vm370_vm4 = vcmp.eq.f32.partialorder %v346_v23, inf  ;;  %vm358_vm5 = vcmp.eq.f32.partialorder %v344_v15, 0.0  ;;  %v366_v38 = vand.u32 2147483648, %v345_v16 }
  0x75   : > { %703 = vrsqrt.f32 %v346_v23  ;;  %vm365_vm6 = vcmp.eq.f32.partialorder %v345_v16, 0.0  ;;  %v373_v30 = vand.u32 2147483648, %v346_v23  ;;  %vm372_vm7 = vcmp.eq.f32.partialorder %v346_v23, 0.0 }
  0x7c   : > { %v698_v20 = vpop.eup %697 }
  0x7d   : > { %v700_v26 = vpop.eup %699  ;;  %v348_v32 = vmul.f32 %v698_v20, %v343_v14 }
  0x7e   : > { %v702_v21 = vpop.eup %701  ;;  %v355_v33 = vmul.f32 %v700_v26, %v344_v15 }
  0x7f   : > { %v704_v29 = vpop.eup %703  ;;  %v362_v34 = vmul.f32 %v702_v21, %v345_v16  ;;  %v350_v36 = vsel %vm349_vm0, %v343_v14, %v348_v32 }
  0x80   : > { %v369_v24 = vmul.f32 %v704_v29, %v346_v23  ;;  %v357_v28 = vsel %vm356_vm1, %v344_v15, %v355_v33  ;;  %v353_v40 = vsel %vm351_vm3, %v352_v35, %v350_v36 }
  0x81   : > { %v364_v39 = vsel %vm363_vm2, %v345_v16, %v362_v34  ;;  %v360_v42 = vsel %vm358_vm5, %v359_v37, %v357_v28  ;;  %v375_v45 = vadd.f32 1e-06, %v353_v40 }
  0x82   : > { %v371_v41 = vsel %vm370_vm4, %v346_v23, %v369_v24  ;;  %v367_v43 = vsel %vm365_vm6, %v366_v38, %v364_v39  ;;  %v376_v46 = vadd.f32 1e-06, %v360_v42 }
  0x83   : > { %v374_v44 = vsel %vm372_vm7, %v373_v30, %v371_v41  ;;  %v377_v47 = vadd.f32 1e-06, %v367_v43  ;;  %705 = vrcp.f32 %v375_v45 }
  0x84   : > { %v378_v48 = vadd.f32 1e-06, %v374_v44  ;;  %707 = vrcp.f32 %v376_v46 }
  0x85   : > { %709 = vrcp.f32 %v377_v47 }
  0x86   : > { %711 = vrcp.f32 %v378_v48 }
  0x8d   : > { %v706_v49 = vpop.eup %705 }
  0x8e   : > { %v708_v50 = vpop.eup %707  ;;  %v387_v55 = vmul.f32 %v706_v49, %v1091_v2  ;;  %v383_v59 = vmul.f32 %v706_v49, %v1089_v1  ;;  %v395_v2 = vmul.f32 %v706_v49, %v1137_v25 }
  0x8f   : > { %v710_v51 = vpop.eup %709  ;;  %v388_v56 = vmul.f32 %v708_v50, %v1096_v4  ;;  %v384_v60 = vmul.f32 %v708_v50, %v1094_v3  ;;  %v396_v4 = vmul.f32 %v708_v50, %v1142_v27 }
  0x90   : > { %v712_v54 = vpop.eup %711  ;;  %v389_v57 = vmul.f32 %v710_v51, %v1102_v10  ;;  %v385_v61 = vmul.f32 %v710_v51, %v1099_v9  ;;  %v391_v10 = vmul.f32 %v706_v49, %v1109_v5  ;;  %v397_v11 = vmul.f32 %v710_v51, %v1147_v31 }
  0x91   : > { %v390_v58 = vmul.f32 %v712_v54, %v1107_v18  ;;  %v386_v62 = vmul.f32 %v712_v54, %v1105_v17  ;;  %v392_v18 = vmul.f32 %v708_v50, %v1116_v12  ;;  %v398_v1 = vmul.f32 %v712_v54, %v1152_v22 }
  0x92   : > { %v393_v3 = vmul.f32 %v710_v51, %v1123_v13  ;;  %v394_v9 = vmul.f32 %v712_v54, %v1130_v19 }
  0xc1   : > { %v412_v52 = vpop.permute.xlu1 %411  ;;  %v402_v53 = vpop.permute.xlu0 %401 }
  0xc2   : > { %v419_v27 = vmul.f32 %v402_v53, %v383_v59  ;;  %v420_v5 = vmul.f32 %v402_v53, %v384_v60  ;;  %v421_v8 = vmul.f32 %v402_v53, %v385_v61  ;;  %v422_v12 = vmul.f32 %v402_v53, %v386_v62 }
  0xc3   : > { %v427_v24 = vmul.f32 %v412_v52, %v391_v10  ;;  %v428_v36 = vmul.f32 %v412_v52, %v392_v18  ;;  %v429_v37 = vmul.f32 %v412_v52, %v393_v3  ;;  %v430_v28 = vmul.f32 %v412_v52, %v394_v9 }
  0xc5   : > { %v417_v63 = vpop.permute.xlu1 %416  ;;  %v407_v0 = vpop.permute.xlu0 %406 }
  0xc6   : > { %v423_v17 = vmul.f32 %v407_v0, %v387_v55  ;;  %v424_v6 = vmul.f32 %v407_v0, %v388_v56  ;;  %v425_v25 = vmul.f32 %v407_v0, %v389_v57  ;;  %v426_v7 = vmul.f32 %v407_v0, %v390_v58 }
  0xc7   : > { %v431_v21 = vmul.f32 %v417_v63, %v395_v2  ;;  %v432_v29 = vmul.f32 %v417_v63, %v396_v4  ;;  %v433_v32 = vmul.f32 %v417_v63, %v397_v11  ;;  %v434_v33 = vmul.f32 %v417_v63, %v398_v1 }
  0xc9   : > { %v443_v14 = vpop.permute.xlu1 %442  ;;  %v438_v31 = vpop.permute.xlu0 %437 }
  0xca   : > { %v459_v15 = vadd.f32 %v443_v14, %v423_v17  ;;  %v460_v22 = vadd.f32 %v443_v14, %v424_v6  ;;  %v461_v16 = vadd.f32 %v443_v14, %v425_v25  ;;  %v462_v13 = vadd.f32 %v443_v14, %v426_v7 }
  0xcb   : > { %v455_v19 = vadd.f32 %v438_v31, %v419_v27  ;;  %v456_v23 = vadd.f32 %v438_v31, %v420_v5  ;;  %v457_v20 = vadd.f32 %v438_v31, %v421_v8  ;;  %v458_v26 = vadd.f32 %v438_v31, %v422_v12 }
  0xcc   : > { %475 = vst [vmem:[%s1187_s26 + $0x20] sm:$0xff] %v459_v15  ;;  %476 = vst [vmem:[%s1187_s26 + $0x28] sm:$0xff] %v460_v22 }
  0xcd   : > { %477 = vst [vmem:[%s1187_s26 + $0x30] sm:$0xff] %v461_v16  ;;  %478 = vst [vmem:[%s1187_s26 + $0x38] sm:$0xff] %v462_v13  ;;  %v453_v34 = vpop.permute.xlu1 %452  ;;  %v448_v35 = vpop.permute.xlu0 %447 }
  0xce   : > { %471 = vst [vmem:[%s1187_s26] sm:$0xff] %v455_v19  ;;  %472 = vst [vmem:[%s1187_s26 + $0x8] sm:$0xff] %v456_v23  ;;  %v467_v38 = vadd.f32 %v453_v34, %v431_v21  ;;  %v468_v39 = vadd.f32 %v453_v34, %v432_v29  ;;  %v469_v30 = vadd.f32 %v453_v34, %v433_v32 }
  0xcf   : > { %473 = vst [vmem:[%s1187_s26 + $0x10] sm:$0xff] %v457_v20  ;;  %474 = vst [vmem:[%s1187_s26 + $0x18] sm:$0xff] %v458_v26  ;;  %v470_v40 = vadd.f32 %v453_v34, %v434_v33  ;;  %v463_v41 = vadd.f32 %v448_v35, %v427_v24  ;;  %v464_v42 = vadd.f32 %v448_v35, %v428_v36 }
  0xd0   : > { %v465_v43 = vadd.f32 %v448_v35, %v429_v37  ;;  %v466_v44 = vadd.f32 %v448_v35, %v430_v28  ;;  %483 = vst [vmem:[%s1187_s26 + $0x60] sm:$0xff] %v467_v38  ;;  %484 = vst [vmem:[%s1187_s26 + $0x68] sm:$0xff] %v468_v39 }
  0xd1   : > { %485 = vst [vmem:[%s1187_s26 + $0x70] sm:$0xff] %v469_v30  ;;  %486 = vst [vmem:[%s1187_s26 + $0x78] sm:$0xff] %v470_v40 }
  0xd2   : > { %479 = vst [vmem:[%s1187_s26 + $0x40] sm:$0xff] %v463_v41  ;;  %480 = vst [vmem:[%s1187_s26 + $0x48] sm:$0xff] %v464_v42 }
  0xd3   : > { %481 = vst [vmem:[%s1187_s26 + $0x50] sm:$0xff] %v465_v43  ;;  %482 = vst [vmem:[%s1187_s26 + $0x58] sm:$0xff] %v466_v44 }
  0xd4   : > { %756 = shalt.err (!%p753_p4)
}
  0xd5   : > { %s757_s27 = scalar_lea.hbm %s1201_s10, 2048  ;;  %s761_s15 = scalar_lea.hbm %s1268_s3, 8192 }
  0xd6   : > { %p758_p6 = scmp.ne.s32.totalorder %s1201_s10, %s757_s27  ;;  %p762_p1 = scmp.lt.u32.totalorder %s1201_s10, %s1268_s3 }
  0xd7   : > { %p763_p3 = scmp.lt.u32.totalorder %s761_s15, %s757_s27  ;;  %p765_p8 = scmp.lt.u32.totalorder %s757_s27, %s1201_s10 }
  0xd8   : > { %p759_p7 = pnand %p758_p6, %p1276_p9 }
  0xd9   : > { %p764_p5 = por %p763_p3, %p762_p1 }
  0xda   : > { %p760_p10 = pneg %p759_p7 }
  0xdb   : > { %p766_p12 = por %p765_p8, %p764_p5 }
  0xdd   : > { %p767_p0 = pnand %p766_p12, %p760_p10 }
  0xdf   : > { %770 = shalt.err (!%p767_p0)
}
  0xe0   : > { %s849_s21 = smov 512   ;;  %s850_s9 = smov 1024  }
  0xe1   : > { %s851_s11 = smov 32  }
  0xe2   : > { %612 = dma.vmem_to_hbm [thread:$0]  (%p1276_p9), %s1203_s8, 2048, %s1201_s10, %s488_s5, %s849_s21, %s850_s9, %s851_s11  }
  0xe3 PF: > { %p623_p11 = scmp.ge.s32.totalorder %s841_s19, 2  ;;  %s518_s25 = sand.u32 1, %s813_s12  }
  0xe4   : > { %p1277_p13 = scmp.ne.s32.totalorder %s1273_s4, 0  ;;  %s519_s24 = scalar_lea.sflag [#allocation4], %s518_s25 }
  0xe6   : > { %p619_p2 = pnand %p623_p11, %p1277_p13 }
  0xe8   : > { %808 = dma.done.wait (!%p619_p2), %s519_s24, 2048  }
  0xe9   : > { %810 = vsyncadd (!%p619_p2), %s519_s24, 4294965248  ;;  %s19_s19 = sadd.s32 1, %s841_s19   ;;  %s1278_s12 = smov %s817_s13 }
  0xea   : > { %p16_p4 = scmp.ge.s32.totalorder %s19_s19, 6   ;;  %s1279_s13 = smov %s821_s14 }
  0xeb   : > { %s1280_s14 = smov %s950_s6  ;;  %s1281_s15 = smov %s833_s17 }
  0xec   : > { %s1282_s16 = smov %s837_s18  ;;  %s1283_s17 = smov %s1286_s22 }
  0xed   : > { %s1284_s18 = smov %s1290_s23  ;;  %18 = sbr.rel (!%p16_p4) target bundleno = 7 (0x7), region = 77 }
  0xf4   :  { %524 = vsyncpa [#allocation3], 1 }
  0xf5   :  { %526 = vsyncpa [#allocation3 + $0x1], 1 }
  0xf6   :  { %527 = vsyncpa [#allocation4], 1 }
  0xf7   :  { %529 = vsyncpa [#allocation4 + $0x1], 1 }

</bundles_post_ra>
